<compile_context>
chip_gen: v5e
topology: v5e:2x2
jax: 0.10.0
libtpu: 0.0.40
codegen_flags: <defaults>
</compile_context>

<pallas_src>
import jax
import jax.numpy as jnp
from jax.experimental import pallas as pl
from jax.experimental.pallas import tpu as pltpu

LANE = 128
XW_RESIDENT_MAX_BYTES = 8 * 1024 * 1024  # keep resident XW (x2 buffers) well inside 32 MiB


def _round_up(x, m):
    return ((x + m - 1) // m) * m


def _pick_tile(n_pad, tile_target):
    # Largest 128-multiple <= tile_target that divides n_pad (n_pad is a 128-multiple).
    t = max(LANE, (min(tile_target, n_pad) // LANE) * LANE)
    while n_pad % t:
        t -= LANE
    return t


def _pad2d(a, rows, cols):
    return jnp.pad(a, ((0, rows - a.shape[0]), (0, cols - a.shape[1])))


def build_binary_adjacency(edge_index, num_nodes, n_pad):
    """Binary (A+I) produced directly as padded int8 (0/1 exact), plus d^-1/2 column.

    A_norm = D^-1/2 (A+I) D^-1/2 is applied in factorized form: XW rows pre-scaled by
    d^-1/2 (kernel 1) and output rows post-scaled by d^-1/2 (aggregation finalize).
    NOTE: duplicate edges collapse to weight 1 (simple-graph semantics), self loops forced to 1.
    """
    src, dst = edge_index
    a = jnp.zeros((n_pad, n_pad), jnp.int8)
    a = a.at[src, dst].set(1)
    a = a.at[dst, src].set(1)                      # undirected
    diag = jnp.arange(num_nodes)
    a = a.at[diag, diag].set(1)                    # self loops (real nodes only)
    deg = jnp.sum(a, axis=-1, dtype=jnp.float32)   # padded rows have deg 0
    d_inv_sqrt = jnp.where(deg > 0.0, jax.lax.rsqrt(jnp.maximum(deg, 1.0)), 0.0)
    return a, d_inv_sqrt.reshape(n_pad, 1)


# ---------------- kernel 1: XW_scaled = (X @ W_gcn) * d^-1/2  (computed once) ----------------
def feature_transform_kernel(x_ref, w_ref, dinv_ref, xw_ref):
    xw = jnp.dot(x_ref[...], w_ref[...], preferred_element_type=jnp.float32)
    xw_ref[...] = (xw * dinv_ref[...]).astype(xw_ref.dtype)


# ---- kernel 2: ACC = (A+I) @ XW_scaled (tiled); finalize: d^-1/2 * ACC + b, relu, head ----
def make_aggregate_head_kernel(tile, xw_resident):
    def kernel(a_ref, xw_ref, dinv_ref, bg_ref, wl_ref, bl_ref, o_ref, acc_ref):
        k = pl.program_id(1)

        @pl.when(k == 0)
        def _():
            acc_ref[...] = jnp.zeros_like(acc_ref)

        if xw_resident:
            # XW is fetched once (constant index_map) and sliced per contraction step.
            off = pl.multiple_of(k * tile, LANE)
            xw_tile = xw_ref[pl.ds(off, tile), :]
        else:
            xw_tile = xw_ref[...]

        # int8 binary (A+I) tile -> bf16 on the VPU (hidden under the A DMA; kernel is
        # HBM-bound), bf16 x bf16 on the MXU, f32 accumulation in VMEM scratch.
        a_bf = a_ref[...].astype(jnp.bfloat16)
        acc_ref[...] += jnp.dot(a_bf, xw_tile, preferred_element_type=jnp.float32)

        @pl.when(k == pl.num_programs(1) - 1)
        def _():
            # Post-scale rows by d^-1/2 (completes A_norm), bias, ReLU, Linear head.
            h = jnp.maximum(acc_ref[...] * dinv_ref[...] + bg_ref[...], 0.0)
            y = jnp.dot(h.astype(jnp.bfloat16), wl_ref[...],
                        preferred_element_type=jnp.float32) + bl_ref[...]
            o_ref[...] = y.astype(o_ref.dtype)

    return kernel


def tg_model_wrapper_forward(x, edge_index, w_gcn, b_gcn, w_lin, b_lin,
                             *, tile_target=1024, xw_resident=None):
    n, f_in = x.shape
    out_ch = w_gcn.shape[1]
    num_classes = w_lin.shape[1]

    # Lane-dense padded widths (multiples of 128) so all vst are unmasked.
    f_pad = _round_up(f_in, LANE)
    ch_pad = _round_up(out_ch, LANE)
    cl_pad = _round_up(num_classes, LANE)

    # Pad rows only to a lane multiple; pick the largest tile that divides n_pad.
    n_pad = _round_up(n, LANE)
    tile = _pick_tile(n_pad, tile_target)
    n_tiles = n_pad // tile

    if xw_resident is None:
        xw_resident = (n_pad * ch_pad * 2) <= XW_RESIDENT_MAX_BYTES

    # Padded binary (A+I) int8 + d^-1/2, built directly at the padded shape.
    a_bin, d_inv_sqrt = build_binary_adjacency(edge_index, n, n_pad)

    x_p = _pad2d(x, n_pad, f_pad).astype(jnp.float32)
    wg_p = _pad2d(w_gcn, f_pad, ch_pad).astype(jnp.float32)
    bg_p = _pad2d(b_gcn.reshape(1, -1), 1, ch_pad).astype(jnp.float32)
    wl_p = _pad2d(w_lin, ch_pad, cl_pad).astype(jnp.bfloat16)
    bl_p = _pad2d(b_lin.reshape(1, -1), 1, cl_pad).astype(jnp.float32)

    # --- step 1: XW_scaled = (X @ W_gcn) * d^-1/2, once (negligible vs step 2) ---
    xw = pl.pallas_call(
        feature_transform_kernel,
        out_shape=jax.ShapeDtypeStruct((n_pad, ch_pad), jnp.bfloat16),
        grid=(n_tiles,),
        in_specs=[
            pl.BlockSpec((tile, f_pad), lambda i: (i, 0)),
            pl.BlockSpec((f_pad, ch_pad), lambda i: (0, 0)),
            pl.BlockSpec((tile, 1), lambda i: (i, 0)),
        ],
        out_specs=pl.BlockSpec((tile, ch_pad), lambda i: (i, 0)),
        compiler_params=pltpu.CompilerParams(dimension_semantics=("parallel",)),
    )(x_p, wg_p, d_inv_sqrt)

    # --- step 2: tiled aggregation + row scale + ReLU + classification head ---
    if xw_resident:
        xw_spec = pl.BlockSpec((n_pad, ch_pad), lambda i, k: (0, 0))   # fetched once
    else:
        xw_spec = pl.BlockSpec((tile, ch_pad), lambda i, k: (k, 0))    # streamed per k

    out_pad = pl.pallas_call(
        make_aggregate_head_kernel(tile, xw_resident),
        out_shape=jax.ShapeDtypeStruct((n_pad, cl_pad), jnp.bfloat16),
        grid=(n_tiles, n_tiles),
        in_specs=[
            pl.BlockSpec((tile, tile), lambda i, k: (i, k)),       # int8 (A+I) tile
            xw_spec,                                               # XW_scaled (bf16)
            pl.BlockSpec((tile, 1), lambda i, k: (i, 0)),          # d^-1/2 output rows
            pl.BlockSpec((1, ch_pad), lambda i, k: (0, 0)),        # b_gcn (resident)
            pl.BlockSpec((ch_pad, cl_pad), lambda i, k: (0, 0)),   # W_lin (resident, bf16)
            pl.BlockSpec((1, cl_pad), lambda i, k: (0, 0)),        # b_lin (resident)
        ],
        out_specs=pl.BlockSpec((tile, cl_pad), lambda i, k: (i, 0)),
        scratch_shapes=[pltpu.VMEM((tile, ch_pad), jnp.float32)],
        compiler_params=pltpu.CompilerParams(
            dimension_semantics=("parallel", "arbitrary"),
            vmem_limit_bytes=32 * 1024 * 1024,
        ),
    )(a_bin, xw, d_inv_sqrt, bg_p, wl_p, bl_p)

    return out_pad[:n, :num_classes].astype(jnp.float32)


def reference_forward(x, edge_index, w_gcn, b_gcn, w_lin, b_lin):
    # Pure-JAX reference matching the kernel's factorized numerics:
    # binary (A+I) exact; XW*d^-1/2, h, W_lin and output quantized to bf16; f32 accumulation.
    hp = jax.lax.Precision.HIGHEST
    n = x.shape[0]
    src, dst = edge_index
    a = jnp.zeros((n, n), jnp.float32)
    a = a.at[src, dst].set(1.0)
    a = a.at[dst, src].set(1.0)
    diag = jnp.arange(n)
    a = a.at[diag, diag].set(1.0)
    deg = jnp.sum(a, axis=-1)
    dinv = jax.lax.rsqrt(deg)

    xw_q = (jnp.dot(x, w_gcn, precision=hp) * dinv[:, None]
            ).astype(jnp.bfloat16).astype(jnp.float32)
    agg = jnp.dot(a, xw_q, precision=hp) * dinv[:, None]
    h = jnp.maximum(agg + b_gcn.reshape(1, -1), 0.0)
    h_q = h.astype(jnp.bfloat16).astype(jnp.float32)
    wl_q = w_lin.astype(jnp.bfloat16).astype(jnp.float32)
    y = jnp.dot(h_q, wl_q, precision=hp) + b_lin.reshape(1, -1)
    return y.astype(jnp.bfloat16).astype(jnp.float32)


if __name__ == "__main__":
    key = jax.random.PRNGKey(0)
    N = 300          # nodes
    F_IN = 32        # input node feature dim
    OUT_CH = 16      # out_channels of the wrapped GNN model
    NUM_CLASSES = 7  # != 2 and != OUT_CH -> Linear(out_channels, num_classes) head path
    E = 1200         # edges

    k1, k2, k3, k4, k5, k6 = jax.random.split(key, 6)
    src = jax.random.randint(k1, (E,), 0, N)
    dst = jax.random.randint(k2, (E,), 0, N)
    edge_index = jnp.stack([src, dst], axis=0)

    x = jax.random.normal(k3, (N, F_IN), jnp.float32)
    w_gcn = jax.random.normal(k4, (F_IN, OUT_CH), jnp.float32) * 0.1
    b_gcn = jnp.zeros((OUT_CH,), jnp.float32)
    w_lin = jax.random.normal(k5, (OUT_CH, NUM_CLASSES), jnp.float32) * 0.1
    b_lin = jax.random.normal(k6, (NUM_CLASSES,), jnp.float32) * 0.01

    ref = reference_forward(x, edge_index, w_gcn, b_gcn, w_lin, b_lin)

    # Default path: adaptive tile (=> 384 here), XW resident across the contraction loop.
    out = tg_model_wrapper_forward(x, edge_index, w_gcn, b_gcn, w_lin, b_lin)
    out = jax.block_until_ready(out)
    assert out.shape == (N, NUM_CLASSES)
    err = float(jnp.max(jnp.abs(out - ref)))
    assert jnp.allclose(out, ref, atol=1e-2, rtol=1e-2), err

    # Small-tile variant: exercises the multi-step f32 accumulator (init / accumulate / finalize).
    out_small = tg_model_wrapper_forward(x, edge_index, w_gcn, b_gcn, w_lin, b_lin,
                                         tile_target=128)
    out_small = jax.block_until_ready(out_small)
    err_small = float(jnp.max(jnp.abs(out_small - ref)))
    assert jnp.allclose(out_small, ref, atol=1e-2, rtol=1e-2), err_small

    # Streamed-XW variant: fallback BlockSpec used when XW is too large to keep VMEM-resident.
    out_stream = tg_model_wrapper_forward(x, edge_index, w_gcn, b_gcn, w_lin, b_lin,
                                          tile_target=128, xw_resident=False)
    out_stream = jax.block_until_ready(out_stream)
    err_stream = float(jnp.max(jnp.abs(out_stream - ref)))
    assert jnp.allclose(out_stream, ref, atol=1e-2, rtol=1e-2), err_stream

    print("KERNEL_OK")
</pallas_src>

<mosaic_0001>
module attributes {stable_mosaic.version = 11 : i64} {
  func.func @feature_transform_kernel(%arg0: i32, %arg1: memref<384x128xf32, #tpu.memory_space<vmem>>, %arg2: memref<128x128xf32, #tpu.memory_space<vmem>>, %arg3: memref<384x1xf32, #tpu.memory_space<vmem>>, %arg4: memref<384x128xbf16, #tpu.memory_space<vmem>>) attributes {dimension_semantics = [#tpu.dimension_semantics<parallel>], iteration_bounds = array<i64: 1>, scalar_prefetch = 0 : i64, scratch_operands = 0 : i64, tpu.core_type = #tpu.core_type<tc>, window_params = [{transform_indices = @transform_0, window_bounds = array<i64: 384, 128>}, {pipeline_mode = #tpu.pipeline_mode<synchronous>, transform_indices = @transform_1, window_bounds = array<i64: 128, 128>}, {transform_indices = @transform_2, window_bounds = array<i64: 384, 1>}, {transform_indices = @transform_3, window_bounds = array<i64: 384, 128>}]} {
    %c0 = arith.constant 0 : index
    %c0_0 = arith.constant 0 : index
    %0 = vector.load %arg1[%c0, %c0_0] : memref<384x128xf32, #tpu.memory_space<vmem>>, vector<384x128xf32>
    %c0_1 = arith.constant 0 : index
    %c0_2 = arith.constant 0 : index
    %1 = vector.load %arg2[%c0_1, %c0_2] : memref<128x128xf32, #tpu.memory_space<vmem>>, vector<128x128xf32>
    %cst = arith.constant dense<0.000000e+00> : vector<384x128xf32>
    %2 = tpu.matmul %0, %1, %cst {dimension_numbers = #tpu.dot_dimension_numbers<[1], [0], [0], [1], [0, 0, 1, 1], [], []>} : vector<384x128xf32>, vector<128x128xf32>, vector<384x128xf32> -> vector<384x128xf32>
    %c0_3 = arith.constant 0 : index
    %c0_4 = arith.constant 0 : index
    %3 = vector.load %arg3[%c0_3, %c0_4] : memref<384x1xf32, #tpu.memory_space<vmem>>, vector<384x1xf32>
    %4 = vector.broadcast %3 : vector<384x1xf32> to vector<384x128xf32>
    %5 = arith.mulf %2, %4 : vector<384x128xf32>
    %6 = arith.truncf %5 : vector<384x128xf32> to vector<384x128xbf16>
    %c0_5 = arith.constant 0 : index
    %c0_6 = arith.constant 0 : index
    %7 = vector.load %arg4[%c0_5, %c0_6] : memref<384x128xbf16, #tpu.memory_space<vmem>>, vector<384x128xbf16>
    tpu.vector_store %arg4[%c0_5, %c0_6], %6 {strides = array<i32>} : memref<384x128xbf16, #tpu.memory_space<vmem>>, vector<384x128xbf16>,
    return
  }
  func.func @transform_0(%arg0: i32) -> (i32, i32) {
    %c0_i32 = arith.constant 0 : i32
    %c0_i32_0 = arith.constant 0 : i32
    return %arg0, %c0_i32 : i32, i32
  }
  func.func @transform_1(%arg0: i32) -> (i32, i32) {
    %c0_i32 = arith.constant 0 : i32
    %c0_i32_0 = arith.constant 0 : i32
    %c0_i32_1 = arith.constant 0 : i32
    return %c0_i32, %c0_i32_0 : i32, i32
  }
  func.func @transform_2(%arg0: i32) -> (i32, i32) {
    %c0_i32 = arith.constant 0 : i32
    %c0_i32_0 = arith.constant 0 : i32
    return %arg0, %c0_i32 : i32, i32
  }
  func.func @transform_3(%arg0: i32) -> (i32, i32) {
    %c0_i32 = arith.constant 0 : i32
    %c0_i32_0 = arith.constant 0 : i32
    return %arg0, %c0_i32 : i32, i32
  }
}

</mosaic_0001>

<bundles_post_ra>
// kernel: tpu_custom_call.1
= control target key start
LH: loop header
LB: loop body
LE: loop exit
PB: predicated region body
PF: predicated region fallthrough
CT: control target
= control target key end

     0   :  { %8 = vsyncpa [#allocation3], 0  ;;  %s1350_s0 = inlined_call_operand.vmem [shape: f32[384,128], index: 0, kind: input, shape index: {}]   ;;  %s1351_s1 = inlined_call_operand.hbm [shape: f32[128,128], index: 1, kind: input, shape index: {}]   ;;  %s1352_s2 = inlined_call_operand.vmem [shape: f32[384,1], index: 2, kind: input, shape index: {}]   ;;  %s1353_s3 = inlined_call_operand.hbm [shape: bf16[384,128], index: 3, kind: output, shape index: {}]  }
   0x1   :  { %9 = vsyncpa [#allocation4], 0  ;;  %s16_s14 = sshll.u32 %s1351_s1, 4  ;;  %s960_s15 = smov [#allocation2]   ;;  %s17_s14 = int_to_ptr.hbm [resolvable:$true] %s16_s14 }
   0x2   :  { %s18_s16 = sshll.u32 %s960_s15, 4  ;;  %s961_s17 = smov 128   ;;  %s19_s16 = int_to_ptr.vmem [resolvable:$true] %s18_s16 }
   0x3   :  { %s962_s18 = smov 8  }
   0x4   :  { %24 = dma.hbm_to_vmem [thread:$0]  %s17_s14, 2048, %s19_s16, [#allocation3], %s961_s17, %s961_s17, %s962_s18  }
   0x5   :  { %956 = dma.done.wait [#allocation3], 2048  }
   0x6   :  { %957 = vsyncadd [#allocation3], 4294965248  ;;  %v963_v0 = vmov 0   ;;  %v260_v1 = vld [vmem:[%s1352_s2 + $0x20] sm:$0xff]  ;;  %v258_v2 = vld [vmem:[%s1352_s2 + $0x10] sm:$0xff]  ;;  %s694_s17 = sshll.u32 %s1353_s3, 4  ;;  %s695_s17 = int_to_ptr.hbm [resolvable:$true] %s694_s17 }
   0x7   :  { %907 = vset.pattern.permute.xlu2 %v963_v0  ;;  %906 = vset.pattern.permute.xlu1 %v963_v0  ;;  %v256_v3 = vld [vmem:[%s1352_s2] sm:$0xff]  ;;  %v94_v4 = vld [vmem:[#allocation2 + $0x78] sm:$0xff]  ;;  %v93_v5 = vld [vmem:[#allocation2 + $0x70] sm:$0xff]  ;;  %s965_s18 = smov 64   ;;  %s966_s19 = smov 4  }
   0x8   :  { %905 = vset.pattern.permute.xlu0 %v963_v0  ;;  %326 = vperm.xlu2 %907, %v260_v1   ;;  %v92_v6 = vld [vmem:[#allocation2 + $0x68] sm:$0xff]  ;;  %v91_v7 = vld [vmem:[#allocation2 + $0x60] sm:$0xff]  ;;  %v259_v9 = vld [vmem:[%s1352_s2 + $0x18] sm:$0xff] }
   0x9   :  { %316 = vperm.xlu1 %906, %v258_v2   ;;  %306 = vperm.xlu0 %905, %v256_v3   ;;  %v261_v8 = vld [vmem:[%s1352_s2 + $0x28] sm:$0xff]  ;;  %v90_v11 = vld [vmem:[#allocation2 + $0x58] sm:$0xff]  ;;  %v89_v12 = vld [vmem:[#allocation2 + $0x50] sm:$0xff] }
   0xa   :  { %95 = vmatpush.msra.mxu0 %v94_v4  ;;  %850 = vmatpush.msra.mxu1 %v94_v4  ;;  %v257_v10 = vld [vmem:[%s1352_s2 + $0x8] sm:$0xff]  ;;  %v87_v14 = vld [vmem:[#allocation2 + $0x40] sm:$0xff]  ;;  %v263_v16 = vld [vmem:[%s1352_s2 + $0x38] sm:$0xff] }
   0xb   :  { %851 = vmatpush.msra.mxu2 %v94_v4  ;;  %852 = vmatpush.msra.mxu3 %v94_v4  ;;  %v88_v13 = vld [vmem:[#allocation2 + $0x48] sm:$0xff]  ;;  %v264_v15 = vld [vmem:[%s1352_s2 + $0x40] sm:$0xff]  ;;  %v262_v17 = vld [vmem:[%s1352_s2 + $0x30] sm:$0xff] }
   0xc   :  { %96 = vmatpush.msra.mxu0 %v93_v5  ;;  %853 = vmatpush.msra.mxu1 %v93_v5  ;;  %v86_v18 = vld [vmem:[#allocation2 + $0x38] sm:$0xff]  ;;  %v85_v19 = vld [vmem:[#allocation2 + $0x30] sm:$0xff]  ;;  %v84_v20 = vld [vmem:[#allocation2 + $0x28] sm:$0xff] }
   0xd   :  { %854 = vmatpush.msra.mxu2 %v93_v5  ;;  %855 = vmatpush.msra.mxu3 %v93_v5  ;;  %v83_v21 = vld [vmem:[#allocation2 + $0x20] sm:$0xff]  ;;  %v267_v22 = vld [vmem:[%s1352_s2 + $0x58] sm:$0xff]  ;;  %v266_v23 = vld [vmem:[%s1352_s2 + $0x50] sm:$0xff] }
   0xe   :  { %97 = vmatpush.msra.mxu0 %v92_v6  ;;  %856 = vmatpush.msra.mxu1 %v92_v6  ;;  %v265_v24 = vld [vmem:[%s1352_s2 + $0x48] sm:$0xff]  ;;  %v82_v25 = vld [vmem:[#allocation2 + $0x18] sm:$0xff]  ;;  %v81_v26 = vld [vmem:[#allocation2 + $0x10] sm:$0xff] }
   0xf   :  { %857 = vmatpush.msra.mxu2 %v92_v6  ;;  %858 = vmatpush.msra.mxu3 %v92_v6  ;;  %v80_v27 = vld [vmem:[#allocation2 + $0x8] sm:$0xff]  ;;  %v79_v28 = vld [vmem:[#allocation2] sm:$0xff]  ;;  %v270_v33 = vld [vmem:[%s1352_s2 + $0x70] sm:$0xff] }
  0x10   :  { %98 = vmatpush.msra.mxu0 %v91_v7  ;;  %859 = vmatpush.msra.mxu1 %v91_v7  ;;  %v31_v29 = vld [vmem:[%s1350_s0] sm:$0xff]  ;;  %v269_v34 = vld [vmem:[%s1352_s2 + $0x68] sm:$0xff]  ;;  %v271_v42 = vld [vmem:[%s1352_s2 + $0x78] sm:$0xff] }
  0x11   :  { %860 = vmatpush.msra.mxu2 %v91_v7  ;;  %861 = vmatpush.msra.mxu3 %v91_v7  ;;  %v43_v30 = vld [vmem:[%s1350_s0 + $0x60] sm:$0xff]  ;;  %v32_v36 = vld [vmem:[%s1350_s0 + $0x8] sm:$0xff]  ;;  %v33_v43 = vld [vmem:[%s1350_s0 + $0x10] sm:$0xff] }
  0x12   :  { %331 = vperm.xlu2 %907, %v261_v8   ;;  %321 = vperm.xlu1 %906, %v259_v9   ;;  %v55_v31 = vld [vmem:[%s1350_s0 + $0xc0] sm:$0xff]  ;;  %v44_v37 = vld [vmem:[%s1350_s0 + $0x68] sm:$0xff]  ;;  %v45_v44 = vld [vmem:[%s1350_s0 + $0x70] sm:$0xff] }
  0x13   :  { %311 = vperm.xlu0 %905, %v257_v10   ;;  %99 = vmatpush.msra.mxu0 %v90_v11  ;;  %v67_v32 = vld [vmem:[%s1350_s0 + $0x120] sm:$0xff]  ;;  %v56_v38 = vld [vmem:[%s1350_s0 + $0xc8] sm:$0xff]  ;;  %v57_v45 = vld [vmem:[%s1350_s0 + $0xd0] sm:$0xff] }
  0x14   :  { %862 = vmatpush.msra.mxu1 %v90_v11  ;;  %863 = vmatpush.msra.mxu2 %v90_v11  ;;  %v268_v35 = vld [vmem:[%s1352_s2 + $0x60] sm:$0xff]  ;;  %v68_v39 = vld [vmem:[%s1350_s0 + $0x128] sm:$0xff]  ;;  %v69_v46 = vld [vmem:[%s1350_s0 + $0x130] sm:$0xff] }
  0x15   :  { %864 = vmatpush.msra.mxu3 %v90_v11  ;;  %100 = vmatpush.msra.mxu0 %v89_v12  ;;  %v273_v40 = vld [vmem:[%s1352_s2 + $0x88] sm:$0xff]  ;;  %v272_v41 = vld [vmem:[%s1352_s2 + $0x80] sm:$0xff]  ;;  %v275_v48 = vld [vmem:[%s1352_s2 + $0x98] sm:$0xff] }
  0x16   :  { %865 = vmatpush.msra.mxu1 %v89_v12  ;;  %866 = vmatpush.msra.mxu2 %v89_v12  ;;  %v276_v47 = vld [vmem:[%s1352_s2 + $0xa0] sm:$0xff]  ;;  %v274_v49 = vld [vmem:[%s1352_s2 + $0x90] sm:$0xff]  ;;  %v34_v50 = vld [vmem:[%s1350_s0 + $0x18] sm:$0xff] }
  0x17   :  { %867 = vmatpush.msra.mxu3 %v89_v12  ;;  %101 = vmatpush.msra.mxu0 %v88_v13  ;;  %v46_v51 = vld [vmem:[%s1350_s0 + $0x78] sm:$0xff]  ;;  %v278_v55 = vld [vmem:[%s1352_s2 + $0xb0] sm:$0xff]  ;;  %v277_v56 = vld [vmem:[%s1352_s2 + $0xa8] sm:$0xff] }
  0x18   :  { %868 = vmatpush.msra.mxu1 %v88_v13  ;;  %869 = vmatpush.msra.mxu2 %v88_v13  ;;  %v58_v52 = vld [vmem:[%s1350_s0 + $0xd8] sm:$0xff]  ;;  %v35_v57 = vld [vmem:[%s1350_s0 + $0x20] sm:$0xff]  ;;  %v282_v61 = vld [vmem:[%s1352_s2 + $0xd0] sm:$0xff] }
  0x19   :  { %870 = vmatpush.msra.mxu3 %v88_v13  ;;  %102 = vmatpush.msra.mxu0 %v87_v14  ;;  %v70_v53 = vld [vmem:[%s1350_s0 + $0x138] sm:$0xff]  ;;  %v47_v58 = vld [vmem:[%s1350_s0 + $0x80] sm:$0xff]  ;;  %v281_v62 = vld [vmem:[%s1352_s2 + $0xc8] sm:$0xff] }
  0x1a   :  { %871 = vmatpush.msra.mxu1 %v87_v14  ;;  %872 = vmatpush.msra.mxu2 %v87_v14  ;;  %v279_v54 = vld [vmem:[%s1352_s2 + $0xb8] sm:$0xff]  ;;  %v59_v59 = vld [vmem:[%s1350_s0 + $0xe0] sm:$0xff]  ;;  %v36_v0 = vld [vmem:[%s1350_s0 + $0x28] sm:$0xff] }
  0x1b   :  { %873 = vmatpush.msra.mxu3 %v87_v14  ;;  %346 = vperm.xlu2 %907, %v264_v15   ;;  %v71_v60 = vld [vmem:[%s1350_s0 + $0x140] sm:$0xff]  ;;  %v48_v1 = vld [vmem:[%s1350_s0 + $0x88] sm:$0xff]  ;;  %v283_v6 = vld [vmem:[%s1352_s2 + $0xd8] sm:$0xff] }
  0x1c   :  { %341 = vperm.xlu1 %906, %v263_v16   ;;  %336 = vperm.xlu0 %905, %v262_v17   ;;  %v280_v63 = vld [vmem:[%s1352_s2 + $0xc0] sm:$0xff]  ;;  %v60_v2 = vld [vmem:[%s1350_s0 + $0xe8] sm:$0xff]  ;;  %v37_v7 = vld [vmem:[%s1350_s0 + $0x30] sm:$0xff] }
  0x1d   :  { %103 = vmatpush.msra.mxu0 %v86_v18  ;;  %874 = vmatpush.msra.mxu1 %v86_v18  ;;  %v72_v3 = vld [vmem:[%s1350_s0 + $0x148] sm:$0xff]  ;;  %v284_v5 = vld [vmem:[%s1352_s2 + $0xe0] sm:$0xff]  ;;  %v49_v8 = vld [vmem:[%s1350_s0 + $0x90] sm:$0xff] }
  0x1e   :  { %875 = vmatpush.msra.mxu2 %v86_v18  ;;  %876 = vmatpush.msra.mxu3 %v86_v18  ;;  %v285_v4 = vld [vmem:[%s1352_s2 + $0xe8] sm:$0xff]  ;;  %v61_v9 = vld [vmem:[%s1350_s0 + $0xf0] sm:$0xff]  ;;  %v288_v11 = vld [vmem:[%s1352_s2 + $0x100] sm:$0xff] }
  0x1f   :  { %104 = vmatpush.msra.mxu0 %v85_v19  ;;  %877 = vmatpush.msra.mxu1 %v85_v19  ;;  %v73_v10 = vld [vmem:[%s1350_s0 + $0x150] sm:$0xff]  ;;  %v287_v12 = vld [vmem:[%s1352_s2 + $0xf8] sm:$0xff] }
  0x20   :  { %878 = vmatpush.msra.mxu2 %v85_v19  ;;  %879 = vmatpush.msra.mxu3 %v85_v19  ;;  %v286_v13 = vld [vmem:[%s1352_s2 + $0xf0] sm:$0xff]  ;;  %v38_v14 = vld [vmem:[%s1350_s0 + $0x38] sm:$0xff] }
  0x21   :  { %105 = vmatpush.msra.mxu0 %v84_v20  ;;  %880 = vmatpush.msra.mxu1 %v84_v20  ;;  %v50_v15 = vld [vmem:[%s1350_s0 + $0x98] sm:$0xff]  ;;  %v290_v19 = vld [vmem:[%s1352_s2 + $0x110] sm:$0xff] }
  0x22   :  { %881 = vmatpush.msra.mxu2 %v84_v20  ;;  %882 = vmatpush.msra.mxu3 %v84_v20  ;;  %v62_v16 = vld [vmem:[%s1350_s0 + $0xf8] sm:$0xff]  ;;  %v289_v20 = vld [vmem:[%s1352_s2 + $0x108] sm:$0xff] }
  0x23   :  { %106 = vmatpush.msra.mxu0 %v83_v21  ;;  %883 = vmatpush.msra.mxu1 %v83_v21  ;;  %v74_v17 = vld [vmem:[%s1350_s0 + $0x158] sm:$0xff] }
  0x24   :  { %884 = vmatpush.msra.mxu2 %v83_v21  ;;  %885 = vmatpush.msra.mxu3 %v83_v21  ;;  %v291_v18 = vld [vmem:[%s1352_s2 + $0x118] sm:$0xff] }
  0x25   :  { %361 = vperm.xlu2 %907, %v267_v22   ;;  %356 = vperm.xlu1 %906, %v266_v23   ;;  %v39_v22 = vld [vmem:[%s1350_s0 + $0x40] sm:$0xff] }
  0x26   :  { %351 = vperm.xlu0 %905, %v265_v24   ;;  %107 = vmatpush.msra.mxu0 %v82_v25  ;;  %v51_v23 = vld [vmem:[%s1350_s0 + $0xa0] sm:$0xff] }
  0x27   :  { %886 = vmatpush.msra.mxu1 %v82_v25  ;;  %887 = vmatpush.msra.mxu2 %v82_v25  ;;  %v63_v24 = vld [vmem:[%s1350_s0 + $0x100] sm:$0xff] }
  0x28   :  { %888 = vmatpush.msra.mxu3 %v82_v25  ;;  %108 = vmatpush.msra.mxu0 %v81_v26  ;;  %v75_v25 = vld [vmem:[%s1350_s0 + $0x160] sm:$0xff] }
  0x29   :  { %889 = vmatpush.msra.mxu1 %v81_v26  ;;  %890 = vmatpush.msra.mxu2 %v81_v26 }
  0x2a   :  { %891 = vmatpush.msra.mxu3 %v81_v26  ;;  %109 = vmatpush.msra.mxu0 %v80_v27  ;;  %v294_v26 = vld [vmem:[%s1352_s2 + $0x130] sm:$0xff] }
  0x2b   :  { %892 = vmatpush.msra.mxu1 %v80_v27  ;;  %893 = vmatpush.msra.mxu2 %v80_v27 }
  0x2c   :  { %894 = vmatpush.msra.mxu3 %v80_v27  ;;  %110 = vmatpush.msra.mxu0 %v79_v28  ;;  %v293_v27 = vld [vmem:[%s1352_s2 + $0x128] sm:$0xff] }
  0x2d   :  { %895 = vmatpush.msra.mxu1 %v79_v28  ;;  %896 = vmatpush.msra.mxu2 %v79_v28 }
  0x2e   :  { %897 = vmatpush.msra.mxu3 %v79_v28  ;;  %111 = vmatmul.f32.vlgmr.msra.gmra.mxu0 %v31_v29  ;;  %v292_v28 = vld [vmem:[%s1352_s2 + $0x120] sm:$0xff] }
  0x2f   :  { %147 = vmatmul.f32.vlgmr.msra.gmra.mxu1 %v43_v30  ;;  %183 = vmatmul.f32.vlgmr.msra.gmra.mxu2 %v55_v31  ;;  %v40_v30 = vld [vmem:[%s1350_s0 + $0x48] sm:$0xff] }
  0x30   :  { %219 = vmatmul.f32.vlgmr.msra.gmra.mxu3 %v67_v32  ;;  %376 = vperm.xlu2 %907, %v270_v33   ;;  %v52_v31 = vld [vmem:[%s1350_s0 + $0xa8] sm:$0xff] }
  0x31   :  { %371 = vperm.xlu1 %906, %v269_v34   ;;  %366 = vperm.xlu0 %905, %v268_v35   ;;  %v64_v32 = vld [vmem:[%s1350_s0 + $0x108] sm:$0xff]  ;;  %v296_v35 = vld [vmem:[%s1352_s2 + $0x140] sm:$0xff] }
  0x32   :  { %v76_v33 = vld [vmem:[%s1350_s0 + $0x168] sm:$0xff] }
  0x33   :  { %v297_v34 = vld [vmem:[%s1352_s2 + $0x148] sm:$0xff] }
  0x36   :  { %114 = vmatmul.f32.gmra.mxu0 %v32_v36  ;;  %v295_v36 = vld [vmem:[%s1352_s2 + $0x138] sm:$0xff] }
  0x37   :  { %150 = vmatmul.f32.gmra.mxu1 %v44_v37  ;;  %186 = vmatmul.f32.gmra.mxu2 %v56_v38 }
  0x38   :  { %222 = vmatmul.f32.gmra.mxu3 %v68_v39  ;;  %391 = vperm.xlu2 %907, %v273_v40   ;;  %v41_v39 = vld [vmem:[%s1350_s0 + $0x50] sm:$0xff] }
  0x39   :  { %386 = vperm.xlu1 %906, %v272_v41   ;;  %381 = vperm.xlu0 %905, %v271_v42   ;;  %v53_v40 = vld [vmem:[%s1350_s0 + $0xb0] sm:$0xff] }
  0x3a   :  { %v65_v42 = vld [vmem:[%s1350_s0 + $0x110] sm:$0xff] }
  0x3e   :  { %117 = vmatmul.f32.gmra.mxu0 %v33_v43  ;;  %v77_v43 = vld [vmem:[%s1350_s0 + $0x170] sm:$0xff] }
  0x3f   :  { %153 = vmatmul.f32.gmra.mxu1 %v45_v44  ;;  %189 = vmatmul.f32.gmra.mxu2 %v57_v45  ;;  %v300_v44 = vld [vmem:[%s1352_s2 + $0x160] sm:$0xff]  ;;  %v299_v45 = vld [vmem:[%s1352_s2 + $0x158] sm:$0xff] }
  0x40   :  { %225 = vmatmul.f32.gmra.mxu3 %v69_v46  ;;  %406 = vperm.xlu2 %907, %v276_v47   ;;  %v298_v46 = vld [vmem:[%s1352_s2 + $0x150] sm:$0xff]  ;;  %v42_v47 = vld [vmem:[%s1350_s0 + $0x58] sm:$0xff] }
  0x41   :  { %401 = vperm.xlu1 %906, %v275_v48   ;;  %396 = vperm.xlu0 %905, %v274_v49   ;;  %v54_v48 = vld [vmem:[%s1350_s0 + $0xb8] sm:$0xff] }
  0x46   :  { %120 = vmatmul.f32.gmra.mxu0 %v34_v50  ;;  %v66_v50 = vld [vmem:[%s1350_s0 + $0x118] sm:$0xff] }
  0x47   :  { %156 = vmatmul.f32.gmra.mxu1 %v46_v51  ;;  %192 = vmatmul.f32.gmra.mxu2 %v58_v52  ;;  %v78_v51 = vld [vmem:[%s1350_s0 + $0x178] sm:$0xff]  ;;  %s964_s0 = smov [#allocation5]  }
  0x48   :  { %228 = vmatmul.f32.gmra.mxu3 %v70_v53  ;;  %421 = vperm.xlu2 %907, %v279_v54   ;;  %v303_v53 = vld [vmem:[%s1352_s2 + $0x178] sm:$0xff]  ;;  %v302_v54 = vld [vmem:[%s1352_s2 + $0x170] sm:$0xff] }
  0x49   :  { %416 = vperm.xlu1 %906, %v278_v55   ;;  %411 = vperm.xlu0 %905, %v277_v56   ;;  %v301_v56 = vld [vmem:[%s1352_s2 + $0x168] sm:$0xff]  ;;  %s692_s2 = sshll.u32 %s964_s0, 4  ;;  %s693_s2 = int_to_ptr.vmem [resolvable:$true] %s692_s2 }
  0x4e   :  { %123 = vmatmul.f32.gmra.mxu0 %v35_v57 }
  0x4f   :  { %159 = vmatmul.f32.gmra.mxu1 %v47_v58  ;;  %195 = vmatmul.f32.gmra.mxu2 %v59_v59 }
  0x50   :  { %231 = vmatmul.f32.gmra.mxu3 %v71_v60  ;;  %436 = vperm.xlu2 %907, %v282_v61  }
  0x51   :  { %431 = vperm.xlu1 %906, %v281_v62   ;;  %426 = vperm.xlu0 %905, %v280_v63  }
  0x56   :  { %126 = vmatmul.f32.gmra.mxu0 %v36_v0 }
  0x57   :  { %162 = vmatmul.f32.gmra.mxu1 %v48_v1  ;;  %198 = vmatmul.f32.gmra.mxu2 %v60_v2 }
  0x58   :  { %234 = vmatmul.f32.gmra.mxu3 %v72_v3  ;;  %451 = vperm.xlu2 %907, %v285_v4  }
  0x59   :  { %446 = vperm.xlu1 %906, %v284_v5   ;;  %441 = vperm.xlu0 %905, %v283_v6  }
  0x5e   :  { %129 = vmatmul.f32.gmra.mxu0 %v37_v7 }
  0x5f   :  { %165 = vmatmul.f32.gmra.mxu1 %v49_v8  ;;  %201 = vmatmul.f32.gmra.mxu2 %v61_v9 }
  0x60   :  { %237 = vmatmul.f32.gmra.mxu3 %v73_v10  ;;  %466 = vperm.xlu2 %907, %v288_v11  }
  0x61   :  { %461 = vperm.xlu1 %906, %v287_v12   ;;  %456 = vperm.xlu0 %905, %v286_v13  }
  0x62   :  { %v1194_v21 = vpop.permute.xlu2 %326 }
  0x66   :  { %132 = vmatmul.f32.gmra.mxu0 %v38_v14 }
  0x67   :  { %168 = vmatmul.f32.gmra.mxu1 %v50_v15  ;;  %204 = vmatmul.f32.gmra.mxu2 %v62_v16 }
  0x68   :  { %240 = vmatmul.f32.gmra.mxu3 %v74_v17  ;;  %481 = vperm.xlu2 %907, %v291_v18  }
  0x69   :  { %476 = vperm.xlu1 %906, %v290_v19   ;;  %471 = vperm.xlu0 %905, %v289_v20  }
  0x6c   :  { %v1217_v29 = vpop.permute.xlu2 %331 }
  0x6e   :  { %135 = vmatmul.f32.gmra.mxu0 %v39_v22 }
  0x6f   :  { %171 = vmatmul.f32.gmra.mxu1 %v51_v23  ;;  %207 = vmatmul.f32.gmra.mxu2 %v63_v24 }
  0x70   :  { %243 = vmatmul.f32.gmra.mxu3 %v75_v25  ;;  %496 = vperm.xlu2 %907, %v294_v26  }
  0x71   :  { %491 = vperm.xlu1 %906, %v293_v27   ;;  %486 = vperm.xlu0 %905, %v292_v28  }
  0x75   :  { %v1240_v37 = vpop.permute.xlu2 %346 }
  0x76   :  { %138 = vmatmul.f32.gmra.mxu0 %v40_v30 }
  0x77   :  { %174 = vmatmul.f32.gmra.mxu1 %v52_v31  ;;  %210 = vmatmul.f32.gmra.mxu2 %v64_v32 }
  0x78   :  { %246 = vmatmul.f32.gmra.mxu3 %v76_v33  ;;  %511 = vperm.xlu2 %907, %v297_v34  }
  0x79   :  { %506 = vperm.xlu1 %906, %v296_v35   ;;  %501 = vperm.xlu0 %905, %v295_v36  }
  0x7b   :  { %v1242_v38 = vpop.permute.xlu1 %316  ;;  %v307_v41 = vpop.permute.xlu0 %306 }
  0x7e   :  { %141 = vmatmul.f32.gmra.mxu0 %v41_v39 }
  0x7f   :  { %177 = vmatmul.f32.gmra.mxu1 %v53_v40  ;;  %213 = vmatmul.f32.gmra.mxu2 %v65_v42  ;;  %v1271_v49 = vpop.permute.xlu2 %361 }
  0x80   :  { %249 = vmatmul.f32.gmra.mxu3 %v77_v43  ;;  %526 = vperm.xlu2 %907, %v300_v44  }
  0x81   :  { %521 = vperm.xlu1 %906, %v299_v45   ;;  %516 = vperm.xlu0 %905, %v298_v46  }
  0x84   :  { %v322_v52 = vpop.permute.xlu1 %321 }
  0x85   :  { %v312_v55 = vpop.permute.xlu0 %311 }
  0x86   :  { %144 = vmatmul.f32.gmra.mxu0 %v42_v47 }
  0x87   :  { %180 = vmatmul.f32.gmra.mxu1 %v54_v48  ;;  %216 = vmatmul.f32.gmra.mxu2 %v66_v50 }
  0x88   :  { %252 = vmatmul.f32.gmra.mxu3 %v78_v51  ;;  %541 = vperm.xlu2 %907, %v303_v53  }
  0x89   :  { %536 = vperm.xlu1 %906, %v302_v54   ;;  %531 = vperm.xlu0 %905, %v301_v56  }
  0x8a   :  { %v377_v57 = vpop.permute.xlu2 %376 }
  0x8e   :  { %v1288_v58 = vpop.permute.xlu1 %341  ;;  %v1290_v59 = vpop.permute.xlu0 %336 }
  0x92   :  { %v1292_v60 = vpop.permute.xlu2 %391 }
  0x97   :  { %v1294_v61 = vpop.permute.xlu1 %356 }
  0x98   :  { %v1296_v62 = vpop.permute.xlu0 %351 }
  0x9a   :  { %v1298_v63 = vpop.permute.xlu2 %406 }
  0xa2   :  { %v1302_v5 = vpop.permute.xlu2 %421 }
  0xa3   :  { %v372_v0 = vpop.permute.xlu1 %371  ;;  %v367_v1 = vpop.permute.xlu0 %366 }
  0xaa   :  { %v437_v15 = vpop.permute.xlu2 %436 }
  0xab   :  { %v1300_v2 = vpop.permute.xlu1 %386  ;;  %v382_v3 = vpop.permute.xlu0 %381 }
  0xac   :  { %v112_v4 = vpop.f32.mrf.mxu0  ;;  %v148_v6 = vpop.f32.mrf.mxu1 }
  0xad   :  { %v544_v12 = vmul.f32 %v307_v41, %v112_v4  ;;  %v556_v16 = vmul.f32 %v367_v1, %v148_v6 }
  0xb2   :  { %v184_v9 = vpop.f32.mrf.mxu2  ;;  %v452_v27 = vpop.permute.xlu2 %451 }
  0xb3   :  { %v1304_v7 = vpop.permute.xlu1 %401  ;;  %v1306_v8 = vpop.permute.xlu0 %396 }
  0xb4   :  { %v1308_v10 = vpop.f32.mrf.mxu3  ;;  %v115_v11 = vpop.f32.mrf.mxu0 }
  0xb5   :  { %v545_v13 = vmul.f32 %v312_v55, %v115_v11  ;;  %v151_v14 = vpop.f32.mrf.mxu1 }
  0xb6   :  { %v557_v17 = vmul.f32 %v372_v0, %v151_v14 }
  0xb7   :  { %v710_v18 = vpack.c.bf16 %v545_v13, %v544_v12 }
  0xb8   :  { %v740_v19 = vpack.c.bf16 %v557_v17, %v556_v16 }
  0xb9   :  { %711 = vst [vmem:[#allocation5] sm:$0xff] %v710_v18  }
  0xba   :  { %832 = vst [vmem:[#allocation5 + $0x30] sm:$0xff] %v740_v19   ;;  %v187_v23 = vpop.f32.mrf.mxu2  ;;  %v1317_v46 = vpop.permute.xlu2 %466 }
  0xbb   :  { %v1310_v20 = vpop.permute.xlu1 %416  ;;  %v1312_v22 = vpop.permute.xlu0 %411 }
  0xbc   :  { %v223_v24 = vpop.f32.mrf.mxu3  ;;  %v118_v25 = vpop.f32.mrf.mxu0 }
  0xbd   :  { %v154_v26 = vpop.f32.mrf.mxu1  ;;  %v546_v36 = vmul.f32 %v1242_v38, %v118_v25 }
  0xbe   :  { %v558_v41 = vmul.f32 %v377_v57, %v154_v26 }
  0xc2   :  { %v190_v32 = vpop.f32.mrf.mxu2  ;;  %v1321_v11 = vpop.permute.xlu2 %481 }
  0xc3   :  { %v432_v28 = vpop.permute.xlu1 %431  ;;  %v427_v31 = vpop.permute.xlu0 %426  ;;  %v570_v51 = vmul.f32 %v437_v15, %v190_v32 }
  0xc4   :  { %v569_v30 = vmul.f32 %v432_v28, %v187_v23  ;;  %v568_v33 = vmul.f32 %v427_v31, %v184_v9  ;;  %v1314_v34 = vpop.f32.mrf.mxu3  ;;  %v121_v35 = vpop.f32.mrf.mxu0 }
  0xc5   :  { %v547_v39 = vmul.f32 %v322_v52, %v121_v35  ;;  %v157_v40 = vpop.f32.mrf.mxu1 }
  0xc6   :  { %v770_v42 = vpack.c.bf16 %v569_v30, %v568_v33  ;;  %v559_v43 = vmul.f32 %v382_v3, %v157_v40 }
  0xc7   :  { %v715_v44 = vpack.c.bf16 %v547_v39, %v546_v36 }
  0xc8   :  { %838 = vst [vmem:[#allocation5 + $0x60] sm:$0xff] %v770_v42   ;;  %v745_v45 = vpack.c.bf16 %v559_v43, %v558_v41 }
  0xc9   :  { %827 = vst [vmem:[#allocation5 + $0x8] sm:$0xff] %v715_v44  }
  0xca   :  { %833 = vst [vmem:[#allocation5 + $0x38] sm:$0xff] %v745_v45   ;;  %v193_v50 = vpop.f32.mrf.mxu2  ;;  %v497_v28 = vpop.permute.xlu2 %496 }
  0xcb   :  { %v447_v47 = vpop.permute.xlu1 %446  ;;  %v442_v48 = vpop.permute.xlu0 %441 }
  0xcc   :  { %v571_v53 = vmul.f32 %v442_v48, %v193_v50  ;;  %v229_v54 = vpop.f32.mrf.mxu3  ;;  %v124_v55 = vpop.f32.mrf.mxu0 }
  0xcd   :  { %v160_v38 = vpop.f32.mrf.mxu1  ;;  %v548_v4 = vmul.f32 %v1194_v21, %v124_v55 }
  0xce   :  { %v775_v52 = vpack.c.bf16 %v571_v53, %v570_v51  ;;  %v560_v12 = vmul.f32 %v1300_v2, %v160_v38 }
  0xd0   :  { %839 = vst [vmem:[#allocation5 + $0x68] sm:$0xff] %v775_v52  }
  0xd2   :  { %v196_v0 = vpop.f32.mrf.mxu2 }
  0xd3   :  { %v462_v56 = vpop.permute.xlu1 %461  ;;  %v457_v57 = vpop.permute.xlu0 %456  ;;  %v572_v19 = vmul.f32 %v447_v47, %v196_v0 }
  0xd4   :  { %v232_v1 = vpop.f32.mrf.mxu3  ;;  %v127_v3 = vpop.f32.mrf.mxu0 }
  0xd5   :  { %v549_v6 = vmul.f32 %v1217_v29, %v127_v3  ;;  %v163_v9 = vpop.f32.mrf.mxu1 }
  0xd6   :  { %v561_v13 = vmul.f32 %v1292_v60, %v163_v9 }
  0xd7   :  { %v720_v14 = vpack.c.bf16 %v549_v6, %v548_v4 }
  0xd8   :  { %v750_v15 = vpack.c.bf16 %v561_v13, %v560_v12 }
  0xd9   :  { %828 = vst [vmem:[#allocation5 + $0x10] sm:$0xff] %v720_v14  }
  0xda   :  { %834 = vst [vmem:[#allocation5 + $0x40] sm:$0xff] %v750_v15   ;;  %v199_v18 = vpop.f32.mrf.mxu2 }
  0xdb   :  { %v1325_v16 = vpop.permute.xlu1 %476  ;;  %v1327_v17 = vpop.permute.xlu0 %471  ;;  %v573_v21 = vmul.f32 %v452_v27, %v199_v18 }
  0xdc   :  { %v235_v23 = vpop.f32.mrf.mxu3  ;;  %v130_v29 = vpop.f32.mrf.mxu0 }
  0xdd   :  { %v166_v25 = vpop.f32.mrf.mxu1  ;;  %v780_v26 = vpack.c.bf16 %v573_v21, %v572_v19  ;;  %v550_v36 = vmul.f32 %v1290_v59, %v130_v29  ;;  %v582_v59 = vmul.f32 %v497_v28, %v1314_v34 }
  0xde   :  { %v562_v27 = vmul.f32 %v1306_v8, %v166_v25 }
  0xdf   :  { %840 = vst [vmem:[#allocation5 + $0x70] sm:$0xff] %v780_v26  }
  0xe2   :  { %v202_v31 = vpop.f32.mrf.mxu2 }
  0xe3   :  { %v492_v2 = vpop.permute.xlu1 %491  ;;  %v487_v60 = vpop.permute.xlu0 %486 }
  0xe4   :  { %v581_v30 = vmul.f32 %v492_v2, %v223_v24  ;;  %v580_v32 = vmul.f32 %v487_v60, %v1308_v10  ;;  %v238_v33 = vpop.f32.mrf.mxu3  ;;  %v133_v35 = vpop.f32.mrf.mxu0 }
  0xe5   :  { %v551_v39 = vmul.f32 %v1288_v58, %v133_v35  ;;  %v169_v40 = vpop.f32.mrf.mxu1  ;;  %v512_v24 = vpop.permute.xlu2 %511  ;;  %v574_v58 = vmul.f32 %v457_v57, %v202_v31 }
  0xe6   :  { %v800_v41 = vpack.c.bf16 %v581_v30, %v580_v32  ;;  %v563_v42 = vmul.f32 %v1304_v7, %v169_v40  ;;  %v585_v10 = vmul.f32 %v512_v24, %v235_v23 }
  0xe7   :  { %v725_v43 = vpack.c.bf16 %v551_v39, %v550_v36 }
  0xe8   :  { %844 = vst [vmem:[#allocation5 + $0x90] sm:$0xff] %v800_v41   ;;  %v755_v44 = vpack.c.bf16 %v563_v42, %v562_v27 }
  0xe9   :  { %829 = vst [vmem:[#allocation5 + $0x18] sm:$0xff] %v725_v43  }
  0xea   :  { %835 = vst [vmem:[#allocation5 + $0x48] sm:$0xff] %v755_v44   ;;  %v205_v50 = vpop.f32.mrf.mxu2 }
  0xeb   :  { %v507_v45 = vpop.permute.xlu1 %506  ;;  %v502_v48 = vpop.permute.xlu0 %501  ;;  %v575_v53 = vmul.f32 %v462_v56, %v205_v50 }
  0xec   :  { %v584_v47 = vmul.f32 %v507_v45, %v232_v1  ;;  %v583_v51 = vmul.f32 %v502_v48, %v229_v54  ;;  %v241_v8 = vpop.f32.mrf.mxu3  ;;  %v136_v55 = vpop.f32.mrf.mxu0 }
  0xed   :  { %v172_v7 = vpop.f32.mrf.mxu1  ;;  %v785_v0 = vpack.c.bf16 %v575_v53, %v574_v58  ;;  %v552_v34 = vmul.f32 %v1240_v37, %v136_v55  ;;  %v527_v21 = vpop.permute.xlu2 %526 }
  0xee   :  { %v810_v38 = vpack.c.bf16 %v585_v10, %v584_v47  ;;  %v805_v52 = vpack.c.bf16 %v583_v51, %v582_v59  ;;  %v564_v57 = vmul.f32 %v1298_v63, %v172_v7 }
  0xef   :  { %841 = vst [vmem:[#allocation5 + $0x78] sm:$0xff] %v785_v0  }
  0xf0   :  { %846 = vst [vmem:[#allocation5 + $0xa0] sm:$0xff] %v810_v38  }
  0xf1   :  { %845 = vst [vmem:[#allocation5 + $0x98] sm:$0xff] %v805_v52  }
  0xf2   :  { %v208_v1 = vpop.f32.mrf.mxu2 }
  0xf3   :  { %v522_v3 = vpop.permute.xlu1 %521  ;;  %v517_v6 = vpop.permute.xlu0 %516  ;;  %v576_v25 = vmul.f32 %v1317_v46, %v208_v1 }
  0xf4   :  { %v587_v4 = vmul.f32 %v522_v3, %v241_v8  ;;  %v586_v9 = vmul.f32 %v517_v6, %v238_v33  ;;  %v244_v12 = vpop.f32.mrf.mxu3  ;;  %v139_v13 = vpop.f32.mrf.mxu0 }
  0xf5   :  { %v553_v54 = vmul.f32 %v1296_v62, %v139_v13  ;;  %v175_v56 = vpop.f32.mrf.mxu1  ;;  %v588_v28 = vmul.f32 %v527_v21, %v244_v12  ;;  %v542_v27 = vpop.permute.xlu2 %541 }
  0xf6   :  { %v815_v14 = vpack.c.bf16 %v587_v4, %v586_v9  ;;  %v565_v15 = vmul.f32 %v1312_v22, %v175_v56 }
  0xf7   :  { %v730_v18 = vpack.c.bf16 %v553_v54, %v552_v34 }
  0xf8   :  { %847 = vst [vmem:[#allocation5 + $0xa8] sm:$0xff] %v815_v14   ;;  %v760_v19 = vpack.c.bf16 %v565_v15, %v564_v57 }
  0xf9   :  { %830 = vst [vmem:[#allocation5 + $0x20] sm:$0xff] %v730_v18  }
  0xfa   :  { %836 = vst [vmem:[#allocation5 + $0x50] sm:$0xff] %v760_v19   ;;  %v211_v29 = vpop.f32.mrf.mxu2 }
  0xfb   :  { %v532_v23 = vpop.permute.xlu0 %531  ;;  %v577_v37 = vmul.f32 %v1327_v17, %v211_v29 }
  0xfc   :  { %v247_v26 = vpop.f32.mrf.mxu3  ;;  %v142_v62 = vpop.f32.mrf.mxu0 }
  0xfd   :  { %v589_v2 = vmul.f32 %v532_v23, %v247_v26  ;;  %v178_v63 = vpop.f32.mrf.mxu1  ;;  %v790_v30 = vpack.c.bf16 %v577_v37, %v576_v25  ;;  %v554_v33 = vmul.f32 %v1294_v61, %v142_v62  ;;  %v537_v61 = vpop.permute.xlu1 %536 }
  0xfe   :  { %v566_v46 = vmul.f32 %v1310_v20, %v178_v63 }
  0xff   :  { %v820_v60 = vpack.c.bf16 %v589_v2, %v588_v28  ;;  %842 = vst [vmem:[#allocation5 + $0x80] sm:$0xff] %v790_v30  }
 0x101   :  { %848 = vst [vmem:[#allocation5 + $0xb0] sm:$0xff] %v820_v60  }
 0x102   :  { %v214_v22 = vpop.f32.mrf.mxu2 }
 0x104   :  { %v250_v31 = vpop.f32.mrf.mxu3  ;;  %v145_v32 = vpop.f32.mrf.mxu0 }
 0x105   :  { %v555_v35 = vmul.f32 %v1271_v49, %v145_v32  ;;  %v181_v36 = vpop.f32.mrf.mxu1  ;;  %v578_v49 = vmul.f32 %v1325_v16, %v214_v22  ;;  %v590_v43 = vmul.f32 %v537_v61, %v250_v31 }
 0x106   :  { %v567_v17 = vmul.f32 %v1302_v5, %v181_v36 }
 0x107   :  { %v735_v39 = vpack.c.bf16 %v555_v35, %v554_v33 }
 0x108   :  { %v765_v40 = vpack.c.bf16 %v567_v17, %v566_v46 }
 0x109   :  { %831 = vst [vmem:[#allocation5 + $0x28] sm:$0xff] %v735_v39  }
 0x10a   :  { %837 = vst [vmem:[#allocation5 + $0x58] sm:$0xff] %v765_v40   ;;  %v217_v41 = vpop.f32.mrf.mxu2 }
 0x10b   :  { %v579_v42 = vmul.f32 %v1321_v11, %v217_v41 }
 0x10c   :  { %v253_v20 = vpop.f32.mrf.mxu3 }
 0x10d   :  { %v591_v5 = vmul.f32 %v542_v27, %v253_v20  ;;  %v795_v44 = vpack.c.bf16 %v579_v42, %v578_v49 }
 0x10f   :  { %v825_v24 = vpack.c.bf16 %v591_v5, %v590_v43  ;;  %843 = vst [vmem:[#allocation5 + $0x88] sm:$0xff] %v795_v44  }
 0x111   :  { %849 = vst [vmem:[#allocation5 + $0xb8] sm:$0xff] %v825_v24  }
 0x112   :  { %700 = dma.vmem_to_hbm [thread:$0]  %s693_s2, 3072, %s695_s17, [#allocation4], %s965_s18, %s965_s18, %s966_s19  }
 0x113   :  { %958 = dma.done.wait [#allocation4], 3072  }
 0x114   :  { %959 = vsyncadd [#allocation4], 4294964224 }
 0x115   :  { %705 = vsyncpa [#allocation3], 1 }
 0x116   :  { %706 = vsyncpa [#allocation4], 1 }

</bundles_post_ra>
